<compile_context>
chip_gen: v7x
topology: tpu7x:2x2x1
jax: 0.10.0
libtpu: 0.0.40
codegen_flags: <defaults>
</compile_context>

<pallas_src>
import functools

import jax
import jax.numpy as jnp
import numpy as np
from jax import lax
from jax.experimental import pallas as pl
from jax.experimental.pallas import tpu as pltpu

EPS = 1e-5              # PyTorch BatchNorm2d default
NEG_SLOPE = 0.2         # LeakyReLU slope
NUM_CORE_SPLITS = 2     # leading "parallel" grid axis for megacore (v7x) stats partials
VMEM_BUDGET = 20 * 1024 * 1024   # conservative double-buffered working-set budget


def _round_up(x, mult):
    return ((x + mult - 1) // mult) * mult


# ----------------------------- Pallas kernels -----------------------------

def _conv_stats_kernel(w_ref, p_ref, y_ref, sum_ref, sq_ref):
    # Y tile (Cout, tm) = W (Cout, Kp) @ P_T tile (Kp, tm); f32 accumulation on the MXU.
    # Per-channel sum / sum-of-squares accumulated into this core-split's partial.
    @pl.when(pl.program_id(1) == 0)
    def _():
        sum_ref[...] = jnp.zeros_like(sum_ref)
        sq_ref[...] = jnp.zeros_like(sq_ref)

    y = jnp.dot(w_ref[...], p_ref[...], preferred_element_type=jnp.float32)
    y_ref[...] = y
    sum_ref[...] += jnp.sum(y, axis=1, keepdims=True)
    sq_ref[...] += jnp.sum(y * y, axis=1, keepdims=True)


def _bn_lrelu_kernel(y_ref, scale_ref, shift_ref, o_ref):
    # y_hat = y * scale + shift ; LeakyReLU(0.2) == max(y_hat, 0.2 * y_hat)
    yh = y_ref[...] * scale_ref[...] + shift_ref[...]
    o_ref[...] = jnp.maximum(yh, NEG_SLOPE * yh)


# ----------------------------- wrappers -----------------------------------

def _im2col_t(x, k, s):
    # (N, Cin, H, W) -> P_T (K, M), K = Cin*k*k with (c, kh, kw) order, M = N*OH*OW
    n, c, h, w = x.shape
    xp = jnp.pad(x, ((0, 0), (0, 0), (1, 1), (1, 1)))
    oh = (h + 2 - k) // s + 1
    ow = (w + 2 - k) // s + 1
    cols = []
    for i in range(k):
        for j in range(k):
            cols.append(xp[:, :, i:i + oh * s:s, j:j + ow * s:s])   # (N, Cin, OH, OW)
    p = jnp.stack(cols, axis=2)                  # (N, Cin, k*k, OH, OW)
    p = p.reshape(n, c * k * k, oh * ow)         # (N, K, OH*OW)
    p = jnp.transpose(p, (1, 0, 2))              # (K, N, OH*OW)
    return p.reshape(c * k * k, n * oh * ow), (n, oh, ow)


def _pick_tm(m, k_pad, cout, in_bytes):
    # Largest lane tile (multiple of 128, <= 1024) whose double-buffered working set
    # fits the budget (safe on v7x's 64 MiB physical / 32 MiB default scoped VMEM).
    tm = max(128, min(1024, _round_up(m, 128)))
    while tm > 128:
        need = (2 * k_pad * tm * in_bytes        # P_T tile, double-buffered
                + 2 * cout * k_pad * in_bytes    # weight tile (x2 buffers, conservative)
                + 4 * cout * tm * 4)             # f32 y tiles (GEMM out + BN in/out)
        if need <= VMEM_BUDGET:
            break
        tm //= 2
    return tm


@functools.partial(jax.jit, static_argnames=("kernel_size", "stride", "mxu_dtype"))
def conv_block(x, weight, bias, gamma, beta, *, kernel_size, stride,
               mxu_dtype=jnp.bfloat16):
    # Train-mode BatchNorm subtracts the batch mean, so the conv bias cancels exactly.
    del bias
    x = x.astype(jnp.float32)
    k, s = kernel_size, stride
    out_ch, in_ch = weight.shape[0], weight.shape[1]
    kk = in_ch * k * k

    p_t, (n, oh, ow) = _im2col_t(x, k, s)
    m = p_t.shape[1]

    # Pad contraction dim to a multiple of 16 (clean bf16 sublane packing); zero rows
    # of P_T / zero cols of W contribute nothing to the dot.
    k_pad = _round_up(kk, 16)
    in_bytes = jnp.dtype(mxu_dtype).itemsize
    tm = _pick_tm(m, k_pad, out_ch, in_bytes)
    steps = pl.cdiv(pl.cdiv(m, tm), NUM_CORE_SPLITS)
    m_pad = NUM_CORE_SPLITS * steps * tm

    # Zero-padding M is stats-neutral (no bias => padded columns produce exact zeros).
    p_t = jnp.pad(p_t, ((0, k_pad - kk), (0, m_pad - m))).astype(mxu_dtype)
    w2d = jnp.pad(weight.astype(jnp.float32).reshape(out_ch, kk),
                  ((0, 0), (0, k_pad - kk))).astype(mxu_dtype)

    # ---- 1) conv GEMM with fused per-channel sum / sumsq (per core-split partials) ----
    y, psum, psq = pl.pallas_call(
        _conv_stats_kernel,
        out_shape=(
            jax.ShapeDtypeStruct((out_ch, m_pad), jnp.float32),
            jax.ShapeDtypeStruct((NUM_CORE_SPLITS, out_ch, 1), jnp.float32),
            jax.ShapeDtypeStruct((NUM_CORE_SPLITS, out_ch, 1), jnp.float32),
        ),
        grid_spec=pltpu.PrefetchScalarGridSpec(
            num_scalar_prefetch=0,
            grid=(NUM_CORE_SPLITS, steps),
            in_specs=[
                pl.BlockSpec((out_ch, k_pad), lambda c, i: (0, 0)),
                pl.BlockSpec((k_pad, tm), lambda c, i: (0, c * steps + i)),
            ],
            out_specs=(
                pl.BlockSpec((out_ch, tm), lambda c, i: (0, c * steps + i)),
                pl.BlockSpec((None, out_ch, 1), lambda c, i: (c, 0, 0)),
                pl.BlockSpec((None, out_ch, 1), lambda c, i: (c, 0, 0)),
            ),
        ),
        compiler_params=pltpu.CompilerParams(
            dimension_semantics=("parallel", "arbitrary")),
    )(w2d, p_t)

    # Combine core-split partials; fold BN params into a single scale/shift per channel.
    ysum = jnp.sum(psum, axis=0)                         # (Cout, 1)
    ysq = jnp.sum(psq, axis=0)                           # (Cout, 1)
    mean = ysum / m
    var = jnp.maximum(ysq / m - mean * mean, 0.0)        # clamp guards f32 cancellation
    inv = lax.rsqrt(var + EPS)
    scale = gamma.astype(jnp.float32).reshape(out_ch, 1) * inv
    shift = beta.astype(jnp.float32).reshape(out_ch, 1) - mean * scale

    # ---- 2) BN apply + LeakyReLU (lane-dense elementwise) ----
    out = pl.pallas_call(
        _bn_lrelu_kernel,
        out_shape=jax.ShapeDtypeStruct((out_ch, m_pad), jnp.float32),
        grid_spec=pltpu.PrefetchScalarGridSpec(
            num_scalar_prefetch=0,
            grid=(m_pad // tm,),
            in_specs=[
                pl.BlockSpec((out_ch, tm), lambda i: (0, i)),
                pl.BlockSpec((out_ch, 1), lambda i: (0, 0)),
                pl.BlockSpec((out_ch, 1), lambda i: (0, 0)),
            ],
            out_specs=pl.BlockSpec((out_ch, tm), lambda i: (0, i)),
        ),
        compiler_params=pltpu.CompilerParams(dimension_semantics=("parallel",)),
    )(y, scale, shift)

    # (Cout, M) -> NCHW
    out = out[:, :m].reshape(out_ch, n, oh, ow)
    return jnp.transpose(out, (1, 0, 2, 3))


# ----------------------------- reference (pure JAX) ------------------------

def conv_block_ref(x, weight, bias, gamma, beta, *, kernel_size, stride):
    y = lax.conv_general_dilated(
        x.astype(jnp.float32), weight.astype(jnp.float32),
        window_strides=(stride, stride), padding=((1, 1), (1, 1)),
        dimension_numbers=("NCHW", "OIHW", "NCHW"),
    ) + bias.reshape(1, -1, 1, 1)
    mean = jnp.mean(y, axis=(0, 2, 3), keepdims=True)
    var = jnp.mean((y - mean) ** 2, axis=(0, 2, 3), keepdims=True)
    yh = (y - mean) / jnp.sqrt(var + EPS)
    yh = yh * gamma.reshape(1, -1, 1, 1) + beta.reshape(1, -1, 1, 1)
    return jnp.where(yh >= 0, yh, NEG_SLOPE * yh)


# ----------------------------- main ----------------------------------------

if __name__ == "__main__":
    # ConvBlock(in_ch=4, out_ch=8, kernel_size=3, stride=2), input (2, 4, 16, 16)
    N, IN_CH, OUT_CH, H, W = 2, 4, 8, 16, 16
    K, S = 3, 2

    key = jax.random.PRNGKey(0)
    kx, kw, kb, kg, kbe = jax.random.split(key, 5)
    x = jax.random.normal(kx, (N, IN_CH, H, W), dtype=jnp.float32)
    weight = jax.random.normal(kw, (OUT_CH, IN_CH, K, K), dtype=jnp.float32) * 0.1
    bias = jax.random.normal(kb, (OUT_CH,), dtype=jnp.float32) * 0.1
    gamma = 1.0 + 0.1 * jax.random.normal(kg, (OUT_CH,), dtype=jnp.float32)
    beta = 0.1 * jax.random.normal(kbe, (OUT_CH,), dtype=jnp.float32)

    out = conv_block(x, weight, bias, gamma, beta, kernel_size=K, stride=S)
    out = jax.block_until_ready(out)

    ref = conv_block_ref(x, weight, bias, gamma, beta, kernel_size=K, stride=S)
    # bf16 MXU inputs (f32 accumulation) vs f32 reference: tolerance sized for bf16
    # input rounding; BN normalization keeps errors well inside this bound.
    np.testing.assert_allclose(np.asarray(out), np.asarray(ref), rtol=5e-2, atol=5e-2)

    print("KERNEL_OK")
</pallas_src>

<mosaic_0001>
module attributes {stable_mosaic.version = 11 : i64} {
  func.func @_conv_stats_kernel(%arg0: i32, %arg1: i32, %arg2: memref<8x48xbf16, #tpu.memory_space<vmem>>, %arg3: memref<48x128xbf16, #tpu.memory_space<vmem>>, %arg4: memref<8x128xf32, #tpu.memory_space<vmem>>, %arg5: memref<1x8x1xf32, #tpu.memory_space<vmem>>, %arg6: memref<1x8x1xf32, #tpu.memory_space<vmem>>) attributes {dimension_semantics = [#tpu.dimension_semantics<parallel>, #tpu.dimension_semantics<arbitrary>], iteration_bounds = array<i64: 2, 1>, scalar_prefetch = 0 : i64, scratch_operands = 0 : i64, tpu.core_type = #tpu.core_type<tc>, window_params = [{pipeline_mode = #tpu.pipeline_mode<synchronous>, transform_indices = @transform_0, window_bounds = array<i64: 8, 48>}, {transform_indices = @transform_1, window_bounds = array<i64: 48, 128>}, {transform_indices = @transform_2, window_bounds = array<i64: 8, 128>}, {transform_indices = @transform_3, window_bounds = array<i64: 1, 8, 1>}, {transform_indices = @transform_4, window_bounds = array<i64: 1, 8, 1>}]} {
    %c0_i32 = arith.constant 0 : i32
    %0 = arith.cmpi eq, %arg1, %c0_i32 : i32
    %1 = arith.extui %0 : i1 to i32
    %c0_i32_0 = arith.constant 0 : i32
    %2 = arith.cmpi ne, %1, %c0_i32_0 : i32
    scf.if %2 {
      %cst_20 = arith.constant 0.000000e+00 : f32
      %24 = vector.broadcast %cst_20 : f32 to vector<8x1xf32>
      %c0_21 = arith.constant 0 : index
      %c0_22 = arith.constant 0 : index
      %c0_23 = arith.constant 0 : index
      %25 = vector.load %arg5[%c0_21, %c0_22, %c0_23] : memref<1x8x1xf32, #tpu.memory_space<vmem>>, vector<1x8x1xf32>
      %26 = vector.shape_cast %25 : vector<1x8x1xf32> to vector<8x1xf32>
      %27 = vector.shape_cast %24 : vector<8x1xf32> to vector<1x8x1xf32>
      tpu.vector_store %arg5[%c0_21, %c0_22, %c0_23], %27 {strides = array<i32>} : memref<1x8x1xf32, #tpu.memory_space<vmem>>, vector<1x8x1xf32>,
      %cst_24 = arith.constant 0.000000e+00 : f32
      %28 = vector.broadcast %cst_24 : f32 to vector<8x1xf32>
      %c0_25 = arith.constant 0 : index
      %c0_26 = arith.constant 0 : index
      %c0_27 = arith.constant 0 : index
      %29 = vector.load %arg6[%c0_25, %c0_26, %c0_27] : memref<1x8x1xf32, #tpu.memory_space<vmem>>, vector<1x8x1xf32>
      %30 = vector.shape_cast %29 : vector<1x8x1xf32> to vector<8x1xf32>
      %31 = vector.shape_cast %28 : vector<8x1xf32> to vector<1x8x1xf32>
      tpu.vector_store %arg6[%c0_25, %c0_26, %c0_27], %31 {strides = array<i32>} : memref<1x8x1xf32, #tpu.memory_space<vmem>>, vector<1x8x1xf32>,
    } else {
    }
    %c0 = arith.constant 0 : index
    %c0_1 = arith.constant 0 : index
    %3 = vector.load %arg2[%c0, %c0_1] : memref<8x48xbf16, #tpu.memory_space<vmem>>, vector<8x48xbf16>
    %c0_2 = arith.constant 0 : index
    %c0_3 = arith.constant 0 : index
    %4 = vector.load %arg3[%c0_2, %c0_3] : memref<48x128xbf16, #tpu.memory_space<vmem>>, vector<48x128xbf16>
    %cst = arith.constant dense<0.000000e+00> : vector<8x128xf32>
    %5 = tpu.matmul %3, %4, %cst {dimension_numbers = #tpu.dot_dimension_numbers<[1], [0], [0], [1], [0, 0, 1, 1], [], []>} : vector<8x48xbf16>, vector<48x128xbf16>, vector<8x128xf32> -> vector<8x128xf32>
    %c0_4 = arith.constant 0 : index
    %c0_5 = arith.constant 0 : index
    %6 = vector.load %arg4[%c0_4, %c0_5] : memref<8x128xf32, #tpu.memory_space<vmem>>, vector<8x128xf32>
    tpu.vector_store %arg4[%c0_4, %c0_5], %5 {strides = array<i32>} : memref<8x128xf32, #tpu.memory_space<vmem>>, vector<8x128xf32>,
    %c0_6 = arith.constant 0 : index
    %c0_7 = arith.constant 0 : index
    %c0_8 = arith.constant 0 : index
    %7 = vector.load %arg5[%c0_6, %c0_7, %c0_8] : memref<1x8x1xf32, #tpu.memory_space<vmem>>, vector<1x8x1xf32>
    %8 = vector.shape_cast %7 : vector<1x8x1xf32> to vector<8x1xf32>
    %cst_9 = arith.constant dense<0.000000e+00> : vector<8xf32>
    %9 = vector.multi_reduction <add>, %5, %cst_9 [1] : vector<8x128xf32> to vector<8xf32>
    %10 = vector.shape_cast %9 : vector<8xf32> to vector<8x1xf32>
    %11 = arith.addf %8, %10 : vector<8x1xf32>
    %c0_10 = arith.constant 0 : index
    %c0_11 = arith.constant 0 : index
    %c0_12 = arith.constant 0 : index
    %12 = vector.load %arg5[%c0_10, %c0_11, %c0_12] : memref<1x8x1xf32, #tpu.memory_space<vmem>>, vector<1x8x1xf32>
    %13 = vector.shape_cast %12 : vector<1x8x1xf32> to vector<8x1xf32>
    %14 = vector.shape_cast %11 : vector<8x1xf32> to vector<1x8x1xf32>
    tpu.vector_store %arg5[%c0_10, %c0_11, %c0_12], %14 {strides = array<i32>} : memref<1x8x1xf32, #tpu.memory_space<vmem>>, vector<1x8x1xf32>,
    %c0_13 = arith.constant 0 : index
    %c0_14 = arith.constant 0 : index
    %c0_15 = arith.constant 0 : index
    %15 = vector.load %arg6[%c0_13, %c0_14, %c0_15] : memref<1x8x1xf32, #tpu.memory_space<vmem>>, vector<1x8x1xf32>
    %16 = vector.shape_cast %15 : vector<1x8x1xf32> to vector<8x1xf32>
    %17 = arith.mulf %5, %5 : vector<8x128xf32>
    %cst_16 = arith.constant dense<0.000000e+00> : vector<8xf32>
    %18 = vector.multi_reduction <add>, %17, %cst_16 [1] : vector<8x128xf32> to vector<8xf32>
    %19 = vector.shape_cast %18 : vector<8xf32> to vector<8x1xf32>
    %20 = arith.addf %16, %19 : vector<8x1xf32>
    %c0_17 = arith.constant 0 : index
    %c0_18 = arith.constant 0 : index
    %c0_19 = arith.constant 0 : index
    %21 = vector.load %arg6[%c0_17, %c0_18, %c0_19] : memref<1x8x1xf32, #tpu.memory_space<vmem>>, vector<1x8x1xf32>
    %22 = vector.shape_cast %21 : vector<1x8x1xf32> to vector<8x1xf32>
    %23 = vector.shape_cast %20 : vector<8x1xf32> to vector<1x8x1xf32>
    tpu.vector_store %arg6[%c0_17, %c0_18, %c0_19], %23 {strides = array<i32>} : memref<1x8x1xf32, #tpu.memory_space<vmem>>, vector<1x8x1xf32>,
    return
  }
  func.func @transform_0(%arg0: i32, %arg1: i32) -> (i32, i32) {
    %c0_i32 = arith.constant 0 : i32
    %c0_i32_0 = arith.constant 0 : i32
    %c0_i32_1 = arith.constant 0 : i32
    return %c0_i32, %c0_i32_0 : i32, i32
  }
  func.func @transform_1(%arg0: i32, %arg1: i32) -> (i32, i32) {
    %c1_i32 = arith.constant 1 : i32
    %0 = arith.muli %arg0, %c1_i32 : i32
    %1 = arith.addi %0, %arg1 : i32
    %c0_i32 = arith.constant 0 : i32
    %c0_i32_0 = arith.constant 0 : i32
    return %c0_i32, %1 : i32, i32
  }
  func.func @transform_2(%arg0: i32, %arg1: i32) -> (i32, i32) {
    %c1_i32 = arith.constant 1 : i32
    %0 = arith.muli %arg0, %c1_i32 : i32
    %1 = arith.addi %0, %arg1 : i32
    %c0_i32 = arith.constant 0 : i32
    %c0_i32_0 = arith.constant 0 : i32
    return %c0_i32, %1 : i32, i32
  }
  func.func @transform_3(%arg0: i32, %arg1: i32) -> (i32, i32, i32) {
    %c0_i32 = arith.constant 0 : i32
    %c0_i32_0 = arith.constant 0 : i32
    %c0_i32_1 = arith.constant 0 : i32
    return %arg0, %c0_i32, %c0_i32_0 : i32, i32, i32
  }
  func.func @transform_4(%arg0: i32, %arg1: i32) -> (i32, i32, i32) {
    %c0_i32 = arith.constant 0 : i32
    %c0_i32_0 = arith.constant 0 : i32
    %c0_i32_1 = arith.constant 0 : i32
    return %arg0, %c0_i32, %c0_i32_0 : i32, i32, i32
  }
}

module attributes {stable_mosaic.version = 11 : i64} {
  func.func @_bn_lrelu_kernel(%arg0: i32, %arg1: memref<8x128xf32, #tpu.memory_space<vmem>>, %arg2: memref<8x1xf32, #tpu.memory_space<vmem>>, %arg3: memref<8x1xf32, #tpu.memory_space<vmem>>, %arg4: memref<8x128xf32, #tpu.memory_space<vmem>>) attributes {dimension_semantics = [#tpu.dimension_semantics<parallel>], iteration_bounds = array<i64: 2>, scalar_prefetch = 0 : i64, scratch_operands = 0 : i64, tpu.core_type = #tpu.core_type<tc>, window_params = [{transform_indices = @transform_0, window_bounds = array<i64: 8, 128>}, {pipeline_mode = #tpu.pipeline_mode<synchronous>, transform_indices = @transform_1, window_bounds = array<i64: 8, 1>}, {pipeline_mode = #tpu.pipeline_mode<synchronous>, transform_indices = @transform_2, window_bounds = array<i64: 8, 1>}, {transform_indices = @transform_3, window_bounds = array<i64: 8, 128>}]} {
    %c0 = arith.constant 0 : index
    %c0_0 = arith.constant 0 : index
    %0 = vector.load %arg1[%c0, %c0_0] : memref<8x128xf32, #tpu.memory_space<vmem>>, vector<8x128xf32>
    %c0_1 = arith.constant 0 : index
    %c0_2 = arith.constant 0 : index
    %1 = vector.load %arg2[%c0_1, %c0_2] : memref<8x1xf32, #tpu.memory_space<vmem>>, vector<8x1xf32>
    %2 = vector.broadcast %1 : vector<8x1xf32> to vector<8x128xf32>
    %3 = arith.mulf %0, %2 : vector<8x128xf32>
    %c0_3 = arith.constant 0 : index
    %c0_4 = arith.constant 0 : index
    %4 = vector.load %arg3[%c0_3, %c0_4] : memref<8x1xf32, #tpu.memory_space<vmem>>, vector<8x1xf32>
    %5 = vector.broadcast %4 : vector<8x1xf32> to vector<8x128xf32>
    %6 = arith.addf %3, %5 : vector<8x128xf32>
    %cst = arith.constant 2.000000e-01 : f32
    %7 = vector.broadcast %cst : f32 to vector<8x128xf32>
    %8 = arith.mulf %7, %6 : vector<8x128xf32>
    %9 = arith.maximumf %6, %8 : vector<8x128xf32>
    %c0_5 = arith.constant 0 : index
    %c0_6 = arith.constant 0 : index
    %10 = vector.load %arg4[%c0_5, %c0_6] : memref<8x128xf32, #tpu.memory_space<vmem>>, vector<8x128xf32>
    tpu.vector_store %arg4[%c0_5, %c0_6], %9 {strides = array<i32>} : memref<8x128xf32, #tpu.memory_space<vmem>>, vector<8x128xf32>,
    return
  }
  func.func @transform_0(%arg0: i32) -> (i32, i32) {
    %c0_i32 = arith.constant 0 : i32
    %c0_i32_0 = arith.constant 0 : i32
    return %c0_i32, %arg0 : i32, i32
  }
  func.func @transform_1(%arg0: i32) -> (i32, i32) {
    %c0_i32 = arith.constant 0 : i32
    %c0_i32_0 = arith.constant 0 : i32
    %c0_i32_1 = arith.constant 0 : i32
    return %c0_i32, %c0_i32_0 : i32, i32
  }
  func.func @transform_2(%arg0: i32) -> (i32, i32) {
    %c0_i32 = arith.constant 0 : i32
    %c0_i32_0 = arith.constant 0 : i32
    %c0_i32_1 = arith.constant 0 : i32
    return %c0_i32, %c0_i32_0 : i32, i32
  }
  func.func @transform_3(%arg0: i32) -> (i32, i32) {
    %c0_i32 = arith.constant 0 : i32
    %c0_i32_0 = arith.constant 0 : i32
    return %c0_i32, %arg0 : i32, i32
  }
}

</mosaic_0001>

<bundles_post_ra>
// kernel: conv_block.3
= control target key start
LH: loop header
LB: loop body
LE: loop exit
PB: predicated region body
PF: predicated region fallthrough
CT: control target
= control target key end

     0   :  { %s285_s12 = smov 0   ;;  %s302_s0 = inlined_call_operand.vmem [shape: f32[8,256], index: 0, kind: input, shape index: {}]   ;;  %s303_s1 = inlined_call_operand.vmem [shape: f32[8,1], index: 1, kind: input, shape index: {}]   ;;  %s304_s2 = inlined_call_operand.vmem [shape: f32[8,1], index: 2, kind: input, shape index: {}]   ;;  %s305_s3 = inlined_call_operand.vmem [shape: f32[8,256], index: 3, kind: output, shape index: {}]  }
   0x1 LB: > { %s237_s13 = sadd.s32 4294967295, %s262_s12   ;;  %p241_p0 = scmp.ge.s32.totalorder %s262_s12, 1  ;;  %s262_s12 = sphi %s285_s12, %s13_s12  }
   0x2   : > { %p136_p1 = scmp.lt.s32.totalorder %s262_s12, 3 }
   0x4   : > { %p137_p2 = pnand %p241_p0, %p136_p1 }
   0x5   : > { %v167_v0 = vld [vmem:[%s303_s1] sm:$0xff] (!%p137_p2)  ;;  %v264_v1 = vmov (!%p137_p2), 0   ;;  %p158_p3 = scmp.lt.s32.totalorder (!%p137_p2), %s237_s13, 1 }
   0x6   : > { %140 = sbr.rel (%p137_p2) target bundleno = 146 (0x92), region = 32  ;;  %255 = vset.pattern.permute.xlu0 (!%p137_p2), %v264_v1  ;;  %v174_v2 = vld [vmem:[%s304_s2] sm:$0xff] (!%p137_p2) }
   0x7   : > { %170 = vperm.xlu0 (!%p137_p2), %255, %v167_v0  }
   0xb   : > { %177 = vperm.xlu0 (!%p137_p2), %255, %v174_v2  }
   0xd   : > { %s307_s13 = smov (!%p158_p3, %s237_s13), 1 }
   0xe   : > { %s242_s18 = sshll.u32 %s307_s13, 3 }
   0xf   : > { %s161_s21 = scalar_lea.vmem %s302_s0, %s242_s18  ;;  %s165_s24 = scalar_lea.vmem %s305_s3, %s242_s18 }
  0x10   : > { %v166_v4 = vld [vmem:[%s161_s21] sm:$0xff] }
  0x86   : > { %v171_v3 = vpop.permute.xlu0 %170 }
  0x87   : > { %v173_v5 = vmul.f32 %v171_v3, %v166_v4 }
  0x8a   : > { %v178_v6 = vpop.permute.xlu0 %177 }
  0x8b   : > { %v180_v7 = vadd.f32 %v178_v6, %v173_v5 }
  0x8d   : > { %v181_v8 = vmul.f32 0.2, %v180_v7 }
  0x8f   : > { %v182_v9 = vmax.f32 %v180_v7, %v181_v8 }
  0x91   : > { %183 = vst [vmem:[%s165_s24] sm:$0xff] %v182_v9 }
  0x92 PF: > { %s13_s12 = sadd.s32 1, %s262_s12  }
  0x93   : > { %p10_p4 = scmp.ge.s32.totalorder %s13_s12, 4  }
  0x95   :  { %12 = sbr.rel (!%p10_p4) target bundleno = 1 (0x1), region = 62 }

// kernel: conv_block.2
= control target key start
LH: loop header
LB: loop body
LE: loop exit
PB: predicated region body
PF: predicated region fallthrough
CT: control target
= control target key end

     0   :  { %s666_s15 = smov 0   ;;  %s668_s16 = smov 0   ;;  %s745_s0 = inlined_call_operand.vmem [shape: bf16[8,48], index: 0, kind: input, shape index: {}]   ;;  %s746_s1 = inlined_call_operand.vmem [shape: bf16[48,256], index: 1, kind: input, shape index: {}]   ;;  %s747_s2 = inlined_call_operand.vmem [shape: f32[8,256], index: 2, kind: output, shape index: {0}]   ;;  %s748_s3 = inlined_call_operand.vmem [shape: f32[2,8,1], index: 3, kind: output, shape index: {1}]   ;;  %s749_s4 = inlined_call_operand.vmem [shape: f32[2,8,1], index: 4, kind: output, shape index: {2}]  }
   0x1   :  { %s670_s17 = smov 0   ;;  %s672_s18 = smov 0  }
   0x2   :  { %s674_s19 = smov 0  }
   0x3 LB: > { %s27_s20 = sadd.s32 1, %s633_s18  ;;  %p64_p1 = scmp.ne.s32.totalorder %s625_s16, %s621_s15  ;;  %s637_s19 = sphi %s674_s19, %s15_s19   ;;  %s633_s18 = sphi %s672_s18, %s753_s18   ;;  %s629_s17 = sphi %s670_s17, %s752_s17   ;;  %s625_s16 = sphi %s668_s16, %s751_s16   ;;  %s621_s15 = sphi %s666_s15, %s750_s15  }
   0x4   : > { %p29_p0 = scmp.ge.s32.totalorder %s27_s20, 2  ;;  %p65_p2 = scmp.eq.s32.totalorder %s637_s19, 0 }
   0x5   : > { %s57_s22 = sadd.s32 1, %s625_s16  ;;  %p526_p5 = scmp.ge.s32.totalorder %s637_s19, 2 }
   0x6   : > { %s755_s20 = smov (%p29_p0, %s27_s20), 0  ;;  %p66_p3 = por %p65_p2, %p64_p1 }
   0x7   : > { %s54_s21 = ssub.s32 %s633_s18, %s755_s20  ;;  %173 = sbr.rel (%p526_p5) target bundleno = 22 (0x16), region = 20 }
   0x8   : > { %p55_p4 = scmp.eq.s32.totalorder %s54_s21, 0 }
   0xa   : > { %s701_s23 = scalar_select %p55_p4, %s625_s16, %s57_s22  }
   0xe   : > { %176 = sbr.rel (!%p66_p3) target bundleno = 22 (0x16), region = 24  ;;  %s178_s24 = sand.u32 (%p66_p3), 1, %s625_s16  }
   0xf   : > { %s527_s25 = sshll.u32 (%p66_p3), %s633_s18, 2  ;;  %s552_s26 = smul.u32 (%p66_p3), 24, %s178_s24 }
  0x10   : > { %s183_s29 = scalar_lea.vmem (%p66_p3), %s746_s1, %s527_s25 }
  0x11   : > { %v199_v0 = vld [vmem:[%s183_s29] sm:$0xf] (%p66_p3)  ;;  %v201_v1 = vld [vmem:[%s183_s29 + $0x8] sm:$0xf] (%p66_p3)  ;;  %v203_v2 = vld [vmem:[%s183_s29 + $0x10] sm:$0xf] (%p66_p3) }
  0x12   : > { %v205_v3 = vld [vmem:[%s183_s29 + $0x18] sm:$0xf] (%p66_p3)  ;;  %v207_v4 = vld [vmem:[%s183_s29 + $0x20] sm:$0xf] (%p66_p3)  ;;  %s180_s30 = scalar_lea.vmem (%p66_p3), [#allocation2], %s552_s26 }
  0x13   : > { %200 = vst [vmem:[%s180_s30] sm:$0xf] (%p66_p3), %v199_v0  ;;  %202 = vst [vmem:[%s180_s30 + $0x4] sm:$0xf] (%p66_p3), %v201_v1  ;;  %v209_v5 = vld [vmem:[%s183_s29 + $0x28] sm:$0xf] (%p66_p3) }
  0x14   : > { %204 = vst [vmem:[%s180_s30 + $0x8] sm:$0xf] (%p66_p3), %v203_v2  ;;  %206 = vst [vmem:[%s180_s30 + $0xc] sm:$0xf] (%p66_p3), %v205_v3 }
  0x15   : > { %208 = vst [vmem:[%s180_s30 + $0x10] sm:$0xf] %v207_v4  ;;  %210 = vst [vmem:[%s180_s30 + $0x14] sm:$0xf] %v209_v5 }
  0x16 PF: > { %p528_p6 = scmp.ge.s32.totalorder %s637_s19, 1  ;;  %p244_p7 = scmp.lt.s32.totalorder %s637_s19, 3 }
  0x18   : > { %p245_p8 = pnand %p528_p6, %p244_p7 }
  0x19   : > { %s251_s5 = sand.u32 (!%p245_p8), 1, %s621_s15   ;;  %v639_v6 = vmov (!%p245_p8), 0.0   ;;  %vm640_vm0 = vmmov (!%p245_p8), 0   ;;  %v307_v10 = vld [vmem:[%s745_s0] sm:$0xf] (!%p245_p8)  ;;  %vm332_vm1 = vcmask (!%p245_p8), 392192  }
  0x1a   : > { %248 = sbr.rel (%p245_p8) target bundleno = 403 (0x193), region = 65  ;;  %542 = vmatprep.subr.bf16.mxu0 (!%p245_p8), %v639_v6  ;;  %548 = vmatprep.mubr.msk.bf16.mxu0 (!%p245_p8), %vm640_vm0, %v639_v6  ;;  %p286_p9 = scmp.lt.s32.totalorder (!%p245_p8), %s629_s17, 1  ;;  %vm304_vm2 = vcmask (!%p245_p8), 7168  }
  0x1b   : > { %s553_s6 = smul.u32 (!%p245_p8), 24, %s251_s5 }
  0x1d   : > { %s253_s7 = scalar_lea.vmem (!%p245_p8), [#allocation2], %s553_s6 }
  0x1e   : > { %v596_v7 = vld [vmem:[%s253_s7] sm:$0xff] (!%p245_p8)   ;;  %v597_v8 = vld [vmem:[%s253_s7 + $0x8] sm:$0xff] (!%p245_p8)   ;;  %v598_v9 = vld [vmem:[%s253_s7 + $0x10] sm:$0xff] (!%p245_p8)  }
  0x1f   : > { %543 = vmatpush3.bf16.msra.mxu0 (!%p245_p8), %v596_v7 }
  0x20   : > { %544 = vmatprep.subr.bf16.mxu0 (!%p245_p8), %v639_v6 }
  0x21   : > { %s757_s17 = smov (!%p286_p9, %s629_s17), 1 }
  0x22   : > { %s529_s10 = sshll.u32 %s757_s17, 3 }
  0x23   : > { %545 = vmatpush3.bf16.msra.mxu0 %v597_v8  ;;  %s294_s13 = scalar_lea.vmem %s748_s3, %s529_s10  ;;  %s289_s21 = scalar_lea.vmem %s747_s2, %s529_s10 }
  0x24   : > { %546 = vmatprep.subr.bf16.mxu0 %v639_v6  ;;  %305 = vst.msk [vmem:[%s294_s13] sm:$0xff] %vm304_vm2, %v639_v6  ;;  %s298_s24 = scalar_lea.vmem %s749_s4, %s529_s10 }
  0x25   : > { %306 = vst.msk [vmem:[%s298_s24] sm:$0xff] %vm304_vm2, %v639_v6 }
  0x27   : > { %547 = vmatpush3.bf16.msra.mxu0 %v598_v9 }
  0x2a   : > { %549 = vmatmul.mubr.msk.bf16.vlgmr.msra.gmra.mrb[0].mxu0 %vm332_vm1, %v307_v10 }
  0x2b   : > { %v377_v16 = vld [vmem:[%s294_s13] sm:$0xff] }
  0x2c   : > { %v383_v19 = vld [vmem:[%s298_s24] sm:$0xff] }
  0xfd   : > { %v370_v11 = vpop.f32.mrb[0].mxu0 }
  0xfe   : > { %376 = vst [vmem:[%s289_s21] sm:$0xff] %v370_v11  ;;  %378 = vadd.xlane.f32.xlu0 %v370_v11  ;;  %v550_v12 = vpop.f32.mrb[1].mxu0  ;;  %v384_v15 = vmul.f32 %v370_v11, %v370_v11 }
  0xff   : > { %v373_v13 = vpop.f32.mrb[2].mxu0 }
 0x100   : > { %v551_v14 = vpop.f32.mrb[3].mxu0 }
 0x102   : > { %385 = vadd.xlane.f32.xlu0 %v384_v15 }
 0x18b   : > { %v379_v17 = vpop.xlane.xlu0 %378 }
 0x18c   : > { %v380_v18 = vadd.f32 %v379_v17, %v377_v16 }
 0x18e   : > { %382 = vst.msk [vmem:[%s294_s13] sm:$0xff] %vm304_vm2, %v380_v18 }
 0x18f   : > { %v386_v20 = vpop.xlane.xlu0 %385 }
 0x190   : > { %v387_v21 = vadd.f32 %v386_v20, %v383_v19 }
 0x192   : > { %388 = vst.msk [vmem:[%s298_s24] sm:$0xff] %vm304_vm2, %v387_v21 }
 0x193 PF: > { %s15_s19 = sadd.s32 1, %s637_s19   ;;  %s750_s15 = smov %s625_s16 }
 0x194   : > { %p12_p10 = scmp.ge.s32.totalorder %s15_s19, 4   ;;  %s751_s16 = smov %s701_s23 }
 0x195   : > { %s752_s17 = smov %s633_s18  ;;  %s753_s18 = smov %s755_s20 }
 0x196   :  { %14 = sbr.rel (!%p12_p10) target bundleno = 3 (0x3), region = 132 }

</bundles_post_ra>
